<compile_context>
chip_gen: v7x
topology: tpu7x:2x2x1
jax: 0.10.0
libtpu: 0.0.40
codegen_flags: <defaults>
</compile_context>

<pallas_src>
import jax
import jax.numpy as jnp
from jax.experimental import pallas as pl
from jax.experimental.pallas import tpu as pltpu

BN_EPS = 1e-5
_VMEM_LIMIT_BYTES = 48 * 1024 * 1024   # explicit scoped limit; safe on v5e/v6e/v7x
_VMEM_TILE_BUDGET = 32 * 1024 * 1024   # what the double-buffered tiles may use
_MAX_TILE_HW = 2048                    # cap per-step footprint


def _transition_kernel(x_ref, scale_ref, bias_ref, w_ref, o_ref):
    # x_ref:     (1, C_in, TILE_HW)  f32 activation tile
    # scale_ref: (C_in, 1)           f32 folded BN scale = gamma / sqrt(var+eps)
    # bias_ref:  (C_in, 1)           f32 folded BN bias  = beta - mean * scale
    # w_ref:     (C_out, C_in)       bf16 1x1 conv weight
    # o_ref:     (1, C_out, TILE_HW) f32 output tile
    x = x_ref[0]                                                  # (C_in, TILE_HW)
    y = jnp.maximum(x * scale_ref[...] + bias_ref[...], 0.0)      # BN + ReLU, f32 on VPU
    # 1x1 conv == channel contraction on the MXU (bf16 operands, f32 accumulate).
    o_ref[0] = jnp.dot(
        w_ref[...], y.astype(jnp.bfloat16),
        preferred_element_type=jnp.float32,
    ).astype(o_ref.dtype)


def _pick_tile_hw(c_in, c_out, hw):
    """Largest spatial tile (multiple of 128, capped) fitting the VMEM budget."""
    # Fixed-ish residents: (double-buffered) bf16 weight + lane-padded scale/bias.
    c_in_pad = ((c_in + 7) // 8) * 8
    fixed = 2 * (c_in * c_out * 2) + 4 * (c_in_pad * 128 * 4)
    # Per spatial lane: double-buffered f32 input (C_in) + f32 output (C_out).
    per_lane = 2 * c_in * 4 + 2 * c_out * 4
    tile = (_VMEM_TILE_BUDGET - fixed) // per_lane
    tile = int(max(128, min(_MAX_TILE_HW, (tile // 128) * 128)))
    if hw <= tile:
        return hw  # full spatial extent is always a legal block shape
    return tile


def transition_block(x_nchw, params, *, tile_hw=None):
    """x_nchw: (N, C_in, H, W) float32. Returns (N, C_out, H, W) float32."""
    gamma, beta, running_mean, running_var, conv_w = (
        params["gamma"], params["beta"],
        params["running_mean"], params["running_var"],
        params["conv_w"],                               # (C_out, C_in, 1, 1)
    )
    N, C_in, H, W = x_nchw.shape
    C_out = conv_w.shape[0]
    HW = H * W

    # Fold BN into per-channel scale/bias (inference semantics).
    scale = (gamma / jnp.sqrt(running_var + BN_EPS)).astype(jnp.float32)   # (C_in,)
    bias = (beta - running_mean * scale).astype(jnp.float32)               # (C_in,)
    scale2d = scale.reshape(C_in, 1)
    bias2d = bias.reshape(C_in, 1)

    # 1x1 conv weight (C_out, C_in, 1, 1) -> (C_out, C_in), bf16 for the MXU.
    w = conv_w.reshape(C_out, C_in).astype(jnp.bfloat16)

    # NCHW -> (N, C_in, H*W): contiguous view, no transpose / extra HBM pass.
    x_rows = x_nchw.reshape(N, C_in, HW)

    if tile_hw is None:
        tile_hw = _pick_tile_hw(C_in, C_out, HW)
    else:
        tile_hw = min(int(tile_hw), HW) if HW <= tile_hw else int(tile_hw)

    grid = (N, pl.cdiv(HW, tile_hw))   # partial last spatial block handled by Pallas

    cost = pl.CostEstimate(
        flops=int(2 * N * HW * C_in * C_out),
        transcendentals=0,
        bytes_accessed=int(N * HW * (C_in + C_out) * 4 + C_in * C_out * 2 + 2 * C_in * 4),
    )

    out_rows = pl.pallas_call(
        _transition_kernel,
        out_shape=jax.ShapeDtypeStruct((N, C_out, HW), jnp.float32),
        grid_spec=pltpu.PrefetchScalarGridSpec(
            num_scalar_prefetch=0,
            grid=grid,
            in_specs=[
                pl.BlockSpec((1, C_in, tile_hw), lambda n, t: (n, 0, t)),
                pl.BlockSpec((C_in, 1), lambda n, t: (0, 0)),
                pl.BlockSpec((C_in, 1), lambda n, t: (0, 0)),
                pl.BlockSpec((C_out, C_in), lambda n, t: (0, 0)),
            ],
            out_specs=pl.BlockSpec((1, C_out, tile_hw), lambda n, t: (n, 0, t)),
        ),
        compiler_params=pltpu.CompilerParams(
            dimension_semantics=("parallel", "parallel"),
            vmem_limit_bytes=_VMEM_LIMIT_BYTES,
        ),
        cost_estimate=cost,
    )(x_rows, scale2d, bias2d, w)

    # (N, C_out, H*W) -> NCHW: free reshape.
    return out_rows.reshape(N, C_out, H, W)


def init_params(key, in_planes, out_planes):
    k1, k2, k3, k4, k5 = jax.random.split(key, 5)
    return {
        "gamma": 1.0 + 0.1 * jax.random.normal(k1, (in_planes,), jnp.float32),
        "beta": 0.1 * jax.random.normal(k2, (in_planes,), jnp.float32),
        "running_mean": 0.1 * jax.random.normal(k3, (in_planes,), jnp.float32),
        "running_var": jnp.abs(1.0 + 0.1 * jax.random.normal(k4, (in_planes,), jnp.float32)),
        "conv_w": 0.2 * jax.random.normal(k5, (out_planes, in_planes, 1, 1), jnp.float32),
    }


def _reference(x, params):
    scale = params["gamma"] / jnp.sqrt(params["running_var"] + BN_EPS)
    bias = params["beta"] - params["running_mean"] * scale
    y = jnp.maximum(x * scale[None, :, None, None] + bias[None, :, None, None], 0.0)
    c_out, c_in = params["conv_w"].shape[:2]
    w = params["conv_w"].reshape(c_out, c_in)
    return jnp.einsum("nchw,oc->nohw", y, w)


def _check(out, out_ref, tag):
    err = jnp.max(jnp.abs(out - out_ref)) / (jnp.max(jnp.abs(out_ref)) + 1e-6)
    assert out.shape == out_ref.shape, (tag, out.shape, out_ref.shape)
    assert float(err) < 2e-2, (tag, float(err))


if __name__ == "__main__":
    key = jax.random.PRNGKey(0)
    kx1, kx2, kx3, kp1, kp2, kp3 = jax.random.split(key, 6)

    # Small shape consistent with the module spec.
    N, C_in, H, W, C_out = 2, 4, 16, 16, 8
    x1 = jax.random.normal(kx1, (N, C_in, H, W), jnp.float32)
    p1 = init_params(kp1, C_in, C_out)
    out1 = transition_block(x1, p1)
    jax.block_until_ready(out1)
    _check(out1, _reference(x1, p1), "small")

    # Realistic DenseNet-like channel counts (exercises the real layout path).
    x2 = jax.random.normal(kx2, (2, 128, 16, 16), jnp.float32)
    p2 = init_params(kp2, 128, 64)
    out2 = transition_block(x2, p2)
    jax.block_until_ready(out2)
    _check(out2, _reference(x2, p2), "realistic")

    # Ragged spatial extent with a forced small tile -> partial last block path.
    x3 = jax.random.normal(kx3, (2, 16, 20, 20), jnp.float32)   # H*W = 400, not /128
    p3 = init_params(kp3, 16, 8)
    out3 = transition_block(x3, p3, tile_hw=128)
    jax.block_until_ready(out3)
    _check(out3, _reference(x3, p3), "ragged")

    print("KERNEL_OK")
</pallas_src>

<mosaic_0001>
module attributes {stable_mosaic.version = 11 : i64} {
  func.func @_transition_kernel(%arg0: i32, %arg1: i32, %arg2: memref<1x4x256xf32, #tpu.memory_space<vmem>>, %arg3: memref<4x1xf32, #tpu.memory_space<vmem>>, %arg4: memref<4x1xf32, #tpu.memory_space<vmem>>, %arg5: memref<8x4xbf16, #tpu.memory_space<vmem>>, %arg6: memref<1x8x256xf32, #tpu.memory_space<vmem>>) attributes {dimension_semantics = [#tpu.dimension_semantics<parallel>, #tpu.dimension_semantics<parallel>], iteration_bounds = array<i64: 2, 1>, scalar_prefetch = 0 : i64, scratch_operands = 0 : i64, tpu.core_type = #tpu.core_type<tc>, window_params = [{transform_indices = @transform_0, window_bounds = array<i64: 1, 4, 256>}, {pipeline_mode = #tpu.pipeline_mode<synchronous>, transform_indices = @transform_1, window_bounds = array<i64: 4, 1>}, {pipeline_mode = #tpu.pipeline_mode<synchronous>, transform_indices = @transform_2, window_bounds = array<i64: 4, 1>}, {pipeline_mode = #tpu.pipeline_mode<synchronous>, transform_indices = @transform_3, window_bounds = array<i64: 8, 4>}, {transform_indices = @transform_4, window_bounds = array<i64: 1, 8, 256>}]} {
    %c0 = arith.constant 0 : index
    %c0_0 = arith.constant 0 : index
    %c0_1 = arith.constant 0 : index
    %0 = vector.load %arg2[%c0, %c0_0, %c0_1] : memref<1x4x256xf32, #tpu.memory_space<vmem>>, vector<1x4x256xf32>
    %1 = vector.shape_cast %0 : vector<1x4x256xf32> to vector<4x256xf32>
    %c0_2 = arith.constant 0 : index
    %c0_3 = arith.constant 0 : index
    %2 = vector.load %arg3[%c0_2, %c0_3] : memref<4x1xf32, #tpu.memory_space<vmem>>, vector<4x1xf32>
    %3 = vector.broadcast %2 : vector<4x1xf32> to vector<4x256xf32>
    %4 = arith.mulf %1, %3 : vector<4x256xf32>
    %c0_4 = arith.constant 0 : index
    %c0_5 = arith.constant 0 : index
    %5 = vector.load %arg4[%c0_4, %c0_5] : memref<4x1xf32, #tpu.memory_space<vmem>>, vector<4x1xf32>
    %6 = vector.broadcast %5 : vector<4x1xf32> to vector<4x256xf32>
    %7 = arith.addf %4, %6 : vector<4x256xf32>
    %cst = arith.constant 0.000000e+00 : f32
    %8 = vector.broadcast %cst : f32 to vector<4x256xf32>
    %9 = arith.maximumf %7, %8 : vector<4x256xf32>
    %c0_6 = arith.constant 0 : index
    %c0_7 = arith.constant 0 : index
    %10 = vector.load %arg5[%c0_6, %c0_7] : memref<8x4xbf16, #tpu.memory_space<vmem>>, vector<8x4xbf16>
    %11 = arith.truncf %9 : vector<4x256xf32> to vector<4x256xbf16>
    %cst_8 = arith.constant dense<0.000000e+00> : vector<8x256xf32>
    %12 = tpu.matmul %10, %11, %cst_8 {dimension_numbers = #tpu.dot_dimension_numbers<[1], [0], [0], [1], [0, 0, 1, 1], [], []>} : vector<8x4xbf16>, vector<4x256xbf16>, vector<8x256xf32> -> vector<8x256xf32>
    %c0_9 = arith.constant 0 : index
    %c0_10 = arith.constant 0 : index
    %c0_11 = arith.constant 0 : index
    %13 = vector.load %arg6[%c0_9, %c0_10, %c0_11] : memref<1x8x256xf32, #tpu.memory_space<vmem>>, vector<1x8x256xf32>
    %14 = vector.shape_cast %13 : vector<1x8x256xf32> to vector<8x256xf32>
    %15 = vector.shape_cast %12 : vector<8x256xf32> to vector<1x8x256xf32>
    tpu.vector_store %arg6[%c0_9, %c0_10, %c0_11], %15 {strides = array<i32>} : memref<1x8x256xf32, #tpu.memory_space<vmem>>, vector<1x8x256xf32>,
    return
  }
  func.func @transform_0(%arg0: i32, %arg1: i32) -> (i32, i32, i32) {
    %c0_i32 = arith.constant 0 : i32
    %c0_i32_0 = arith.constant 0 : i32
    return %arg0, %c0_i32, %arg1 : i32, i32, i32
  }
  func.func @transform_1(%arg0: i32, %arg1: i32) -> (i32, i32) {
    %c0_i32 = arith.constant 0 : i32
    %c0_i32_0 = arith.constant 0 : i32
    %c0_i32_1 = arith.constant 0 : i32
    return %c0_i32, %c0_i32_0 : i32, i32
  }
  func.func @transform_2(%arg0: i32, %arg1: i32) -> (i32, i32) {
    %c0_i32 = arith.constant 0 : i32
    %c0_i32_0 = arith.constant 0 : i32
    %c0_i32_1 = arith.constant 0 : i32
    return %c0_i32, %c0_i32_0 : i32, i32
  }
  func.func @transform_3(%arg0: i32, %arg1: i32) -> (i32, i32) {
    %c0_i32 = arith.constant 0 : i32
    %c0_i32_0 = arith.constant 0 : i32
    %c0_i32_1 = arith.constant 0 : i32
    return %c0_i32, %c0_i32_0 : i32, i32
  }
  func.func @transform_4(%arg0: i32, %arg1: i32) -> (i32, i32, i32) {
    %c0_i32 = arith.constant 0 : i32
    %c0_i32_0 = arith.constant 0 : i32
    return %arg0, %c0_i32, %arg1 : i32, i32, i32
  }
}

</mosaic_0001>

<bundles_post_ra>
// kernel: tpu_custom_call.1
= control target key start
LH: loop header
LB: loop body
LE: loop exit
PB: predicated region body
PF: predicated region fallthrough
CT: control target
= control target key end

     0   :  { %9 = vsyncpa [#allocation3], 0  ;;  %s835_s0 = inlined_call_operand.hbm [shape: f32[2,4,256], index: 0, kind: input, shape index: {}]   ;;  %s836_s1 = inlined_call_operand.vmem [shape: f32[4,1], index: 1, kind: input, shape index: {}]   ;;  %s837_s2 = inlined_call_operand.vmem [shape: f32[4,1], index: 2, kind: input, shape index: {}]   ;;  %s838_s3 = inlined_call_operand.vmem [shape: bf16[8,4], index: 3, kind: input, shape index: {}]   ;;  %s839_s4 = inlined_call_operand.hbm [shape: f32[2,8,256], index: 4, kind: output, shape index: {}]  }
   0x1   :  { %11 = vsyncpa [#allocation3 + $0x1], 0 }
   0x2   :  { %12 = vsyncpa [#allocation4], 0 }
   0x3   :  { %14 = vsyncpa [#allocation4 + $0x1], 0  ;;  %s653_s15 = smov 0   ;;  %s655_s16 = smov 0  }
   0x4   :  { %s657_s17 = smov 0   ;;  %s659_s18 = smov 0  }
   0x5   :  { %s661_s19 = smov 0   ;;  %s663_s20 = smov 0  }
   0x6 LB: > { %s426_s21 = sadd.s32 4294967295, %s622_s20   ;;  %s427_s22 = sadd.s32 4294967294, %s622_s20   ;;  %s622_s20 = sphi %s663_s20, %s20_s20   ;;  %s618_s19 = sphi %s661_s19, %s855_s19   ;;  %s614_s18 = sphi %s659_s18, %s854_s18   ;;  %s610_s17 = sphi %s657_s17, %s853_s17   ;;  %s606_s16 = sphi %s655_s16, %s852_s16   ;;  %s602_s15 = sphi %s653_s15, %s851_s15  }
   0x7   : > { %s32_s23 = sadd.s32 1, %s618_s19  ;;  %s41_s24 = sadd.s32 1, %s610_s17 }
   0x8   : > { %p34_p0 = scmp.ge.s32.totalorder %s32_s23, 2  ;;  %p48_p1 = scmp.ne.s32.totalorder %s610_s17, %s606_s16 }
   0x9   : > { %p49_p2 = scmp.eq.s32.totalorder %s622_s20, 0  ;;  %p54_p3 = scmp.ne.s32.totalorder %s606_s16, %s602_s15 }
   0xa   : > { %s857_s23 = smov (%p34_p0, %s32_s23), 0  ;;  %p55_p5 = scmp.eq.s32.totalorder %s426_s21, 0 }
   0xb   : > { %p694_p4 = por %p49_p2, %p48_p1  ;;  %s36_s26 = ssub.s32 %s618_s19, %s857_s23 }
   0xc   : > { %p143_p6 = scmp.eq.s32.totalorder %s426_s21, 1  ;;  %p39_p7 = scmp.eq.s32.totalorder %s36_s26, 0 }
   0xd   : > { %p700_p8 = por %p55_p5, %p54_p3  ;;  %p149_p10 = scmp.eq.s32.totalorder %s427_s22, 1 }
   0xe   : > { %p704_p9 = por %p143_p6, %p48_p1  ;;  %p457_p13 = scmp.lt.s32.totalorder %s622_s20, 2 }
   0xf   : > { %s709_s29 = scalar_select %p39_p7, %s610_s17, %s41_s24  }
  0x10   : > { %s843_s28 = scalar_select %p704_p9, 1, 0 }
  0x11   : > { %p711_p11 = por %p149_p10, %p54_p3  ;;  %s178_s5 = sand.u32 1, %s610_s17  }
  0x12   : > { %s430_s6 = sshll.u32 %s178_s5, 3  ;;  %s443_s7 = sshll.u32 %s618_s19, 7 }
  0x13   : > { %s844_s30 = scalar_select %p711_p11, 1, 0 }
  0x14   : > { %s722_s10 = scalar_lea.hbm %s835_s0, %s443_s7  ;;  %s182_s11 = scalar_lea.vmem [#allocation2], %s430_s6 }
  0x15   : > { %s192_s12 = sshll.u32 %s182_s11, 4  ;;  %p728_p0 = pnand %p457_p13, %p694_p4  ;;  %s724_s12 = int_to_ptr.vmem [resolvable:$true] %s192_s12 }
  0x16   : > { %s179_s14 = scalar_lea.sflag [#allocation3], %s178_s5  ;;  %s510_s21 = scalar_lea.hbm %s722_s10, 128 }
  0x17   : > { %p511_p3 = scmp.ne.s32.totalorder %s722_s10, %s510_s21  ;;  %p512_p5 = pneg %p728_p0 }
  0x18   : > { %s515_s25 = scalar_lea.hbm %s835_s0, 256  ;;  %p516_p4 = scmp.lt.u32.totalorder %s722_s10, %s835_s0 }
  0x19   : > { %p513_p6 = pnand %p512_p5, %p511_p3  ;;  %p517_p10 = scmp.lt.u32.totalorder %s515_s25, %s510_s21 }
  0x1a   : > { %p519_p12 = scmp.lt.u32.totalorder %s510_s21, %s722_s10 }
  0x1b   : > { %p514_p7 = pneg %p513_p6  ;;  %p518_p13 = por %p517_p10, %p516_p4 }
  0x1d   : > { %p520_p1 = por %p519_p12, %p518_p13 }
  0x1f   : > { %p521_p2 = pnand %p520_p1, %p514_p7 }
  0x21   : > { %524 = shalt.err (!%p521_p2)
}
  0x22   : > { %s525_s5 = scalar_lea.vmem %s724_s12, 128  ;;  %s624_s7 = smov [#allocation2]  }
  0x23   : > { %p526_p3 = scmp.ne.s32.totalorder %s724_s12, %s525_s5  ;;  %s530_s8 = sshll.u32 %s624_s7, 4  ;;  %s531_s8 = int_to_ptr.vmem [resolvable:$false] %s530_s8 }
  0x24   : > { %s532_s9 = scalar_lea.vmem %s531_s8, 256  ;;  %p533_p9 = scmp.lt.s32.totalorder %s724_s12, %s531_s8 }
  0x25   : > { %p528_p6 = pnand %p526_p3, %p512_p5  ;;  %p534_p4 = scmp.lt.s32.totalorder %s532_s9, %s525_s5 }
  0x27   : > { %p529_p11 = pneg %p528_p6  ;;  %p535_p10 = por %p534_p4, %p533_p9 }
  0x29   : > { %p536_p12 = pnand %p535_p10, %p529_p11 }
  0x2b   : > { %539 = shalt.err (!%p536_p12)
}
  0x2c   : > { %452 = dma.hbm_to_vmem [thread:$0]  (!%p728_p0), %s722_s10, 128, %s724_s12, %s179_s14  }
  0x2d   : > { %p846_p1 = scmp.lt.s32.totalorder %s622_s20, 3  ;;  %p847_p2 = scmp.ge.s32.totalorder %s622_s20, 1 }
  0x2f   : > { %p198_p5 = pnand %p847_p2, %p846_p1 }
  0x30   : > { %s764_s11 = sand.u32 (!%p198_p5), 1, %s606_s16  }
  0x31   : > { %201 = sbr.rel (%p198_p5) target bundleno = 433 (0x1b1), region = 36  ;;  %s434_s21 = sshll.u32 (!%p198_p5), %s764_s11, 3 }
  0x32   : > { %s204_s22 = scalar_lea.sflag (!%p198_p5), [#allocation3], %s764_s11  ;;  %s207_s24 = scalar_lea.vmem (!%p198_p5), [#allocation2], %s434_s21 }
  0x38   : > { %593 = dma.done.wait (%p700_p8), %s204_s22, 128  }
  0x39   : > { %595 = vsyncadd (%p700_p8), %s204_s22, 4294967168  ;;  %v625_v0 = vmov 0   ;;  %v236_v1 = vld [vmem:[%s836_s1] sm:$0xf]  ;;  %v626_v3 = vmov 839922192   ;;  %v244_v5 = vlaneseq }
  0x3a   : > { %509 = vset.pattern.permute.xlu0 %v625_v0  ;;  %314 = vmatprep.mubr.bf16.mxu0 %v625_v0  ;;  %v250_v2 = vld [vmem:[%s837_s2] sm:$0xf]  ;;  %v242_v4 = vunpack.c.l.s4 %v626_v3  ;;  %vm275_vm0 = vcmask 1041408   ;;  %vm271_vm1 = vcmask 31744   ;;  %s435_s26 = sshll.u32 %s764_s11, 4  ;;  %s444_s7 = sshll.u32 %s614_s18, 8 }
  0x3b   : > { %239 = vperm.xlu0 %509, %v236_v1   ;;  %v245_v7 = vshrl.u32 %v244_v5, 7  ;;  %v235_v11 = vld [vmem:[%s207_s24] sm:$0xff]  ;;  %s231_s6 = scalar_lea.vmem [#allocation5], %s435_s26  ;;  %s788_s21 = scalar_lea.hbm %s839_s4, %s444_s7 }
  0x3c   : > { %v243_v6 = vunpack.c.0.s8 %v242_v4  ;;  %v265_v21 = vld [vmem:[%s838_s3] sm:$0xf]  ;;  %s342_s5 = sshll.u32 %s231_s6, 4  ;;  %s326_s22 = scalar_lea.sflag [#allocation4], %s764_s11  ;;  %s783_s5 = int_to_ptr.vmem [resolvable:$true] %s342_s5 }
  0x3d   : > { %s540_s24 = scalar_lea.vmem %s783_s5, 256  ;;  %p848_p9 = scmp.ne.s32.totalorder %s843_s28, 0 }
  0x3e   : > { %v246_v8 = vsub.s32 %v243_v6, %v245_v7  ;;  %p541_p8 = scmp.ne.s32.totalorder %s783_s5, %s540_s24  ;;  %s627_s18 = smov [#allocation5]  }
  0x3f   : > { %253 = vperm.xlu0 %509, %v250_v2   ;;  %s544_s10 = sshll.u32 %s627_s18, 4  ;;  %s545_s10 = int_to_ptr.vmem [resolvable:$false] %s544_s10 }
  0x40   : > { %p542_p11 = pnand %p541_p8, %p848_p9  ;;  %s546_s12 = scalar_lea.vmem %s545_s10, 512 }
  0x41   : > { %p547_p7 = scmp.lt.s32.totalorder %s783_s5, %s545_s10  ;;  %p548_p13 = scmp.lt.s32.totalorder %s546_s12, %s540_s24 }
  0x42   : > { %p543_p0 = pneg %p542_p11 }
  0x43   : > { %p549_p3 = por %p548_p13, %p547_p7 }
  0x45   : > { %p550_p6 = pnand %p549_p3, %p543_p0 }
  0xba   : > { %v240_v9 = vpop.permute.xlu0 %239 }
  0xbb   : > { %v247_v10 = vrot.slane %v240_v9, %v246_v8 }
  0xbd   : > { %v249_v13 = vmul.f32 %v247_v10, %v235_v11 }
  0xbe   : > { %v254_v12 = vpop.permute.xlu0 %253 }
  0xbf   : > { %v261_v14 = vrot.slane %v254_v12, %v246_v8 }
  0xc1   : > { %v263_v15 = vadd.f32 %v261_v14, %v249_v13 }
  0xc3   : > { %v264_v16 = vmax.f32 %v263_v15, 0.0 }
  0xc5   : > { %v267_v17 = vcombine.high %v264_v16, %v264_v16  ;;  %v269_v18 = vpack.c.bf16 %v264_v16, %v264_v16 }
  0xc7   : > { %v270_v19 = vpack.c.bf16 %v267_v17, %v267_v17  ;;  %v277_v20 = vsel %vm275_vm0, %v269_v18, 0 }
  0xc9   : > { %436 = vmatprep.subr.msk.bf16.mxu0 %vm275_vm0, %v270_v19 }
  0xca   : > { %283 = vmatpush1.bf16.msra.mxu0 %v277_v20 }
  0xcd   : > { %437 = vmatmul.mubr.msk.bf16.vlgmr.msra.gmra.mrb[0].mxu0 %vm271_vm1, %v265_v21 }
 0x1a0   : > { %v316_v22 = vpop.f32.mrb[0].mxu0 }
 0x1a1   : > { %323 = vst [vmem:[%s231_s6] sm:$0xff] %v316_v22  ;;  %v318_v23 = vpop.f32.mrb[1].mxu0 }
 0x1a2   : > { %324 = vst [vmem:[%s231_s6 + $0x8] sm:$0xff] %v318_v23  ;;  %v320_v24 = vpop.f32.mrb[2].mxu0 }
 0x1a3   : > { %v321_v25 = vpop.f32.mrb[3].mxu0 }
 0x1a4   : > { %553 = shalt.err (!%p550_p6)
}
 0x1a5   : > { %s554_s11 = scalar_lea.hbm %s788_s21, 256  ;;  %s558_s27 = scalar_lea.hbm %s839_s4, 512 }
 0x1a6   : > { %p555_p4 = scmp.ne.s32.totalorder %s788_s21, %s554_s11  ;;  %p559_p1 = scmp.lt.u32.totalorder %s788_s21, %s839_s4 }
 0x1a7   : > { %p560_p2 = scmp.lt.u32.totalorder %s558_s27, %s554_s11  ;;  %p562_p8 = scmp.lt.u32.totalorder %s554_s11, %s788_s21 }
 0x1a8   : > { %p556_p10 = pnand %p555_p4, %p848_p9 }
 0x1a9   : > { %p561_p5 = por %p560_p2, %p559_p1 }
 0x1aa   : > { %p557_p12 = pneg %p556_p10 }
 0x1ab   : > { %p563_p11 = por %p562_p8, %p561_p5 }
 0x1ad   : > { %p564_p0 = pnand %p563_p11, %p557_p12 }
 0x1af   : > { %567 = shalt.err (!%p564_p0)
}
 0x1b0   : > { %447 = dma.vmem_to_hbm [thread:$0]  (%p848_p9), %s783_s5, 256, %s788_s21, %s326_s22  }
 0x1b1 PF: > { %s354_s6 = sand.u32 1, %s602_s15   ;;  %p849_p7 = scmp.ne.s32.totalorder %s844_s30, 0 }
 0x1b2   : > { %p850_p13 = scmp.ge.s32.totalorder %s622_s20, 2  ;;  %s355_s7 = scalar_lea.sflag [#allocation4], %s354_s6 }
 0x1b4   : > { %p454_p3 = pnand %p850_p13, %p849_p7 }
 0x1b6   : > { %597 = dma.done.wait (!%p454_p3), %s355_s7, 256  }
 0x1b7   : > { %599 = vsyncadd (!%p454_p3), %s355_s7, 4294967040  ;;  %s20_s20 = sadd.s32 1, %s622_s20   ;;  %s851_s15 = smov %s606_s16 }
 0x1b8   : > { %p17_p6 = scmp.ge.s32.totalorder %s20_s20, 4   ;;  %s852_s16 = smov %s610_s17 }
 0x1b9   : > { %s853_s17 = smov %s709_s29  ;;  %s854_s18 = smov %s618_s19 }
 0x1ba   : > { %s855_s19 = smov %s857_s23  ;;  %19 = sbr.rel (!%p17_p6) target bundleno = 6 (0x6), region = 81 }
 0x1c1   :  { %360 = vsyncpa [#allocation3], 1 }
 0x1c2   :  { %362 = vsyncpa [#allocation3 + $0x1], 1 }
 0x1c3   :  { %363 = vsyncpa [#allocation4], 1 }
 0x1c4   :  { %365 = vsyncpa [#allocation4 + $0x1], 1 }

</bundles_post_ra>
